<compile_context>
chip_gen: v5e
topology: v5e:2x2
jax: 0.10.0
libtpu: 0.0.40
codegen_flags: <defaults>
</compile_context>

<pallas_src>
import numpy as np
import jax
import jax.numpy as jnp
from jax.experimental import pallas as pl
from jax.experimental.pallas import tpu as pltpu

_LANE = 128
_VMEM_LIMIT = 32 * 1024 * 1024


def _round_up(x, m):
    return (x + m - 1) // m * m


def _device_kind():
    try:
        return jax.devices()[0].device_kind.lower()
    except Exception:
        return ""


# ----------------------------------------------------------------------------
# Pallas kernel 1: fused  out = relu( X @ W + shift )  (down blocks, BN folded)
# bf16 in, f32 accumulate, bf16 out (layers are HBM-bound; consumers are bf16).
# ----------------------------------------------------------------------------
def _mm_bias_relu_kernel(x_ref, w_ref, b_ref, o_ref):
    acc = jnp.dot(x_ref[...], w_ref[...], preferred_element_type=jnp.float32)
    o_ref[...] = jnp.maximum(acc + b_ref[...], 0.0).astype(o_ref.dtype)


def _pick_bm(m, k, n):
    kind = _device_kind()
    # Conservative per-call VMEM budget: v5e's default scoped limit is 16 MiB;
    # v6e/v7x default to 32 MiB (v7x also only has 64 MiB physical VMEM).
    budget = (14 if "v5" in kind else 28) * 1024 * 1024
    # v7x has 2 TensorCores sharing the grid: force >= 2 parallel steps earlier
    # (no-op on 1-TC v5e/v6e, which keep the single-block fast path longer).
    split_at = 256 if ("v7" in kind or "7x" in kind) else 512
    min_steps = 2 if m >= split_at else 1

    def fits(bm):
        # 2x double-buffered bf16 input + 2x bf16 output + 2x bf16 weight + bias
        return (2 * bm * k * 2 + 2 * bm * n * 2 + 2 * k * n * 2 + 4 * n) <= budget

    for bm in (m, 2048, 1024, 512, 256, 128, 64, 32, 16, 8):
        if bm <= m and m % bm == 0 and m // bm >= min_steps and fits(bm):
            return bm
    return 8


def mm_bias_relu(x, w, b):
    """x:(M,K) bf16, w:(K,N) bf16, b:(1,N) f32 -> relu(x@w + b) : (M,N) bf16."""
    m, k = x.shape
    k2, n = w.shape
    assert k == k2 and n % _LANE == 0
    m_pad = _round_up(m, 8)
    if m_pad != m:
        x = jnp.pad(x, ((0, m_pad - m), (0, 0)))
    bm = _pick_bm(m_pad, k, n)
    y = pl.pallas_call(
        _mm_bias_relu_kernel,
        out_shape=jax.ShapeDtypeStruct((m_pad, n), jnp.bfloat16),
        grid=(m_pad // bm,),
        in_specs=[
            pl.BlockSpec((bm, k), lambda i: (i, 0)),
            pl.BlockSpec((k, n), lambda i: (0, 0)),
            pl.BlockSpec((1, n), lambda i: (0, 0)),
        ],
        out_specs=pl.BlockSpec((bm, n), lambda i: (i, 0)),
        compiler_params=pltpu.CompilerParams(
            dimension_semantics=("parallel",),
            vmem_limit_bytes=_VMEM_LIMIT),
    )(x, w, b)
    return y if m_pad == m else y[:m]


# ----------------------------------------------------------------------------
# Pallas kernel 2: fused post-roi chain (appearance projection already hoisted)
#   h   = relu(obj0 @ Wc + bc)         # SameBlock2d ps x ps conv (== matmul) + ReLU
#   h   = h @ Wl + bl                  # Linear
#   h   = h @ Wr + br                  # roi_align_regressor
#   out = app_proj + h @ Wfo + bf      # fuse_appearance_roi on concat([app, h])
# All weights bf16, zero-padded to 128 lanes; ROI rows tiled over the grid.
# ----------------------------------------------------------------------------
def _roi_chain_kernel(obj_ref, app_ref, wc_ref, bc_ref, wl_ref, bl_ref,
                      wr_ref, br_ref, wfo_ref, bf_ref, o_ref):
    f32, bf16 = jnp.float32, jnp.bfloat16
    h = jnp.dot(obj_ref[...], wc_ref[...], preferred_element_type=f32) + bc_ref[...]
    h = jnp.maximum(h, 0.0)
    h = jnp.dot(h.astype(bf16), wl_ref[...], preferred_element_type=f32) + bl_ref[...]
    h = jnp.dot(h.astype(bf16), wr_ref[...], preferred_element_type=f32) + br_ref[...]
    o_ref[...] = (jnp.dot(h.astype(bf16), wfo_ref[...], preferred_element_type=f32)
                  + app_ref[...] + bf_ref[...])


def _pick_roi_rows(r_pad):
    kind = _device_kind()
    split_at = 256 if ("v7" in kind or "7x" in kind) else 1024
    if r_pad < split_at:
        return r_pad
    for bm in (512, 256, 128, 64, 32, 16, 8):
        if r_pad % bm == 0 and r_pad // bm >= 2:
            return bm
    return 8


def roi_chain(obj0, app_proj, p):
    r, kobj = obj0.shape
    n = p['fuse_obj_w'].shape[1]
    r_pad = _round_up(r, 8)
    if r_pad != r:
        obj0 = jnp.pad(obj0, ((0, r_pad - r), (0, 0)))
        app_proj = jnp.pad(app_proj, ((0, r_pad - r), (0, 0)))
    bm = _pick_roi_rows(r_pad)
    row = lambda i: (i, 0)
    rep = lambda i: (0, 0)
    wargs = (p['roi_conv_w'], p['roi_conv_b'], p['roi_lin_w'], p['roi_lin_b'],
             p['regressor_w'], p['regressor_b'], p['fuse_obj_w'], p['fuse_b'])
    out = pl.pallas_call(
        _roi_chain_kernel,
        out_shape=jax.ShapeDtypeStruct((r_pad, n), jnp.float32),
        grid=(r_pad // bm,),
        in_specs=[pl.BlockSpec((bm, kobj), row),
                  pl.BlockSpec((bm, n), row)]
                + [pl.BlockSpec(a.shape, rep) for a in wargs],
        out_specs=pl.BlockSpec((bm, n), row),
        compiler_params=pltpu.CompilerParams(dimension_semantics=("parallel",)),
    )(obj0, app_proj, *wargs)
    return out[:r]


# ----------------------------------------------------------------------------
# Glue: NHWC conv 4x4 / s2 / p1 via im2col (bf16 taps, single pad, no transpose)
# ----------------------------------------------------------------------------
def conv4x4s2_bn_relu(x_nhwc, w_kkcn, b_1n, cin_pad, cout):
    b_, h, w_, c = x_nhwc.shape
    ho, wo = h // 2, w_ // 2
    # Cast to bf16 FIRST (halves tap/concat HBM traffic); merge the spatial
    # (conv padding=1) and channel (K -> multiple of 128) pads into one call.
    xp = jnp.pad(x_nhwc.astype(jnp.bfloat16),
                 ((0, 0), (1, 1), (1, 1), (0, cin_pad - c)))
    taps = [xp[:, kh:kh + 2 * ho:2, kw:kw + 2 * wo:2, :]
            for kh in range(4) for kw in range(4)]
    cols = jnp.concatenate(taps, axis=-1).reshape(b_ * ho * wo, 16 * cin_pad)
    # TODO(synk): longer term, move this im2col inside the Pallas kernel
    #             (halo'd output-row bands + in-VMEM strided taps) to drop the
    #             XLA-side tap/concat HBM round trip entirely.
    y = mm_bias_relu(cols, w_kkcn, b_1n)              # (M, Npad) bf16, lane-dense
    return y[:, :cout].reshape(b_, ho, wo, cout)      # NHWC bf16


# ----------------------------------------------------------------------------
# Glue: torchvision-style roi_align (aligned=False) as separable interpolation
# matrices -> two small batched einsums (exact: bilinear weights are separable
# and the sample grid is a Cartesian product).
# ----------------------------------------------------------------------------
def _interp_matrix(start, bin_size, out_size, sr, dim):
    offs = (jnp.arange(out_size, dtype=jnp.float32)[None, :, None]
            + (jnp.arange(sr, dtype=jnp.float32)[None, None, :] + 0.5) / sr)
    coords = start[:, None, None] + offs * bin_size[:, None, None]    # (R,out,sr)
    valid = (coords >= -1.0) & (coords <= dim)
    c = jnp.clip(coords, 0.0, dim - 1.0)
    lo = jnp.floor(c)
    loi = lo.astype(jnp.int32)
    hii = jnp.minimum(loi + 1, dim - 1)
    lfrac = c - lo
    hfrac = 1.0 - lfrac
    w = (hfrac[..., None] * jax.nn.one_hot(loi, dim, dtype=jnp.float32)
         + lfrac[..., None] * jax.nn.one_hot(hii, dim, dtype=jnp.float32))
    w = w * valid[..., None].astype(jnp.float32)
    return w.mean(axis=2)                                             # (R,out,dim)


def roi_align_pooled(feat_nhwc, boxes, output_size, spatial_scale, sampling_ratio=2):
    # TODO(synk): torchvision's default sampling_ratio=-1 (adaptive ceil(roi/bin))
    #             is data dependent; a fixed sampling_ratio=2 is used here.
    _, h, w, _ = feat_nhwc.shape
    ph = pw = output_size
    boxes = boxes.astype(jnp.float32)
    bidx = boxes[:, 0].astype(jnp.int32)
    x1 = boxes[:, 1] * spatial_scale
    y1 = boxes[:, 2] * spatial_scale
    x2 = boxes[:, 3] * spatial_scale
    y2 = boxes[:, 4] * spatial_scale
    roi_w = jnp.maximum(x2 - x1, 1.0)
    roi_h = jnp.maximum(y2 - y1, 1.0)
    ay = _interp_matrix(y1, roi_h / ph, ph, sampling_ratio, h)        # (R,ph,H)
    ax = _interp_matrix(x1, roi_w / pw, pw, sampling_ratio, w)        # (R,pw,W)
    fm = jnp.take(feat_nhwc, bidx, axis=0)                            # (R,H,W,C)
    t = jnp.einsum('rih,rhwc->riwc', ay, fm)
    return jnp.einsum('rjw,riwc->rijc', ax, t)                        # (R,ph,pw,C) f32


# ----------------------------------------------------------------------------
# AppearanceEncoder: params + forward
# ----------------------------------------------------------------------------
class AppearanceEncoderPallas:
    def __init__(self, train_params, block_expansion, num_down_blocks,
                 max_expansion, pooling_after, padding_mode, pool_size,
                 scale_factor, image_channel, seg_channel_bg, seg_channel_fg,
                 instance_channel, flow_channel, occlusion_channel, key):
        assert padding_mode == 'zeros'
        self.tp = train_params
        self.nf = train_params['num_input_frames']
        self.num_down_blocks = num_down_blocks
        self.pool_size = pool_size
        self.pooling_after = pooling_after
        self.h_app = int(train_params['input_size'][0] / 2 ** num_down_blocks * scale_factor)
        self.w_app = int(train_params['input_size'][1] / 2 ** num_down_blocks * scale_factor)
        self.spatial_scale = 1 / scale_factor * 2 ** pooling_after

        keys = jax.random.split(key, 64)
        ki = iter(range(64))
        nk = lambda: keys[next(ki)]
        self.params = {}
        self.down_meta = []
        eps = 1e-5
        for i in range(num_down_blocks):
            if i == 0:
                inp = (image_channel + seg_channel_bg + seg_channel_fg + instance_channel) * self.nf \
                      + (flow_channel + occlusion_channel) * (self.nf - 1)
                outp = block_expansion * self.nf
            elif i == num_down_blocks - 1:
                inp = min(max_expansion, block_expansion * 2 ** (i - 1)) * self.nf
                outp = min(max_expansion, block_expansion * 2 ** i)
            else:
                inp = min(max_expansion, block_expansion * 2 ** (i - 1)) * self.nf
                outp = min(max_expansion, block_expansion * 2 ** i) * self.nf
            cin_pad = _round_up(inp, 8)               # K = 16*cin_pad -> multiple of 128
            npad = _round_up(outp, _LANE)             # lane-dense output
            self.down_meta.append((inp, outp, cin_pad, npad))

            w = jax.random.normal(nk(), (outp, inp, 4, 4), jnp.float32) * (1.0 / np.sqrt(inp * 16))
            b = 0.01 * jax.random.normal(nk(), (outp,), jnp.float32)
            gamma = 1.0 + 0.1 * jax.random.normal(nk(), (outp,), jnp.float32)
            beta = 0.1 * jax.random.normal(nk(), (outp,), jnp.float32)
            # BatchNorm eval mode with running_mean=0, running_var=1.
            # TODO(synk): with real checkpoints use scale=gamma/sqrt(var+eps),
            #             shift=beta - mean*scale + b*scale.
            scale = gamma / jnp.sqrt(1.0 + eps)
            shift = beta + b * scale
            # Fold BN scale into the conv weight; reorder to NHWC-im2col rows
            # (kh,kw,c); zero-pad K (cin) and N (cout) at init.
            wf = (w * scale[:, None, None, None]).transpose(2, 3, 1, 0)      # (4,4,cin,cout)
            wf = jnp.pad(wf, ((0, 0), (0, 0), (0, cin_pad - inp), (0, npad - outp)))
            self.params[f'down{i}_w'] = wf.reshape(16 * cin_pad, npad).astype(jnp.bfloat16)
            self.params[f'down{i}_b'] = jnp.pad(shift, (0, npad - outp)).reshape(1, npad)

        self.h_flat_app = self.h_app * self.w_app * outp
        self.last_cout = outp
        roi_in = block_expansion * 2 ** (pooling_after - 1)
        roi_out = block_expansion * 2 ** pooling_after
        self.roi_in, self.roi_out = roi_in, roi_out
        npad = _round_up(2 * roi_out, _LANE)
        ps = pool_size
        kobj = ps * ps * roi_in
        self.kobj_pad = _round_up(kobj, _LANE)        # lane-dense K for the first roi dot

        def padded(a, rows, cols, dtype=None):
            a = jnp.pad(a, ((0, rows - a.shape[0]), (0, cols - a.shape[1])))
            return a.astype(dtype) if dtype is not None else a

        # SameBlock2d conv (kernel=pool_size, stride 1, pad 0, no norm) + ReLU.
        # Weight rows ordered (i,j,c) to match the pooled NHWC flatten.
        wc = jax.random.normal(nk(), (2 * roi_out, roi_in, ps, ps), jnp.float32) \
            * (1.0 / np.sqrt(roi_in * ps * ps))
        wc = wc.transpose(2, 3, 1, 0).reshape(kobj, 2 * roi_out)
        self.params['roi_conv_w'] = padded(wc, self.kobj_pad, npad, jnp.bfloat16)
        self.params['roi_conv_b'] = padded(
            0.01 * jax.random.normal(nk(), (1, 2 * roi_out), jnp.float32), 1, npad)
        wl = jax.random.normal(nk(), (2 * roi_out, 2 * roi_out), jnp.float32) * (1.0 / np.sqrt(2 * roi_out))
        self.params['roi_lin_w'] = padded(wl, npad, npad, jnp.bfloat16)
        self.params['roi_lin_b'] = padded(
            0.01 * jax.random.normal(nk(), (1, 2 * roi_out), jnp.float32), 1, npad)
        wr = jax.random.normal(nk(), (2 * roi_out, roi_out), jnp.float32) * (1.0 / np.sqrt(2 * roi_out))
        self.params['regressor_w'] = padded(wr, npad, npad, jnp.bfloat16)
        self.params['regressor_b'] = padded(
            0.01 * jax.random.normal(nk(), (1, roi_out), jnp.float32), 1, npad)
        # fuse_appearance_roi: Linear(roi_out + h_flat_app -> roi_out).  The
        # concat([app_rep, obj]) input is split: the appearance half is hoisted
        # to a per-batch-row projection (app_proj_w), the object half stays in
        # the kernel (fuse_obj_w).
        din = roi_out + self.h_flat_app
        wfa = jax.random.normal(nk(), (self.h_flat_app, roi_out), jnp.float32) * (1.0 / np.sqrt(din))
        wfo = jax.random.normal(nk(), (roi_out, roi_out), jnp.float32) * (1.0 / np.sqrt(din))
        # Permute the appearance-weight rows from PyTorch's NCHW flatten(1)
        # order (c,h,w) to NHWC flatten order (h,w,c) so the hot path can feed
        # the NHWC feature map directly (no NCHW transpose).
        C, H, W = self.last_cout, self.h_app, self.w_app
        hh, ww, cc = np.meshgrid(np.arange(H), np.arange(W), np.arange(C), indexing='ij')
        nchw_rows = (cc * H * W + hh * W + ww).reshape(-1)
        wfa_nhwc = wfa[nchw_rows]
        self.params['app_proj_w'] = padded(wfa_nhwc, self.h_flat_app, npad, jnp.bfloat16)
        self.params['fuse_obj_w'] = padded(wfo, npad, npad, jnp.bfloat16)
        self.params['fuse_b'] = padded(
            0.01 * jax.random.normal(nk(), (1, roi_out), jnp.float32), 1, npad)

    def forward(self, first_frame, batch_idx, rois_padded, num_real_nodes):
        p = self.params
        nf = self.nf
        out = {}

        # boxes exactly as in the PyTorch reference: node-major batch column
        # (repeat_interleave of the gnn batch index), frame-major ROI rows.
        # Kept verbatim to preserve module semantics.
        boxes = jnp.concatenate(
            [jnp.repeat(batch_idx[:, None].astype(jnp.float32), nf, axis=0),
             jnp.concatenate([rois_padded[:, f, :] for f in range(nf)], axis=0)],
            axis=1)                                              # (N*nf, 5)

        # Down blocks: NHWC + bf16 internally; dict entries exported as NCHW f32.
        x = jnp.transpose(first_frame, (0, 2, 3, 1))             # NCHW -> NHWC once
        feats_nhwc = []
        for i in range(self.num_down_blocks):
            _, outp, cin_pad, _ = self.down_meta[i]
            x = conv4x4s2_bn_relu(x, p[f'down{i}_w'], p[f'down{i}_b'], cin_pad, outp)
            feats_nhwc.append(x)
            key = 'app_encoded' if i == self.num_down_blocks - 1 else f'enco{i}'
            out[key] = jnp.transpose(x, (0, 3, 1, 2)).astype(jnp.float32)   # NCHW

        # roi_align on enco{pooling_after-1}, channel-chunked per frame, stacked
        # on batch (reference semantics preserved, including its batch-column use).
        feat = feats_nhwc[self.pooling_after - 1]
        feat_frames = jnp.concatenate(jnp.split(feat, nf, axis=-1), axis=0)   # (nf*B,H,W,Croi)
        pooled = roi_align_pooled(feat_frames, boxes, self.pool_size,
                                  1.0 / self.spatial_scale)                   # (R,ph,pw,C) f32
        obj0 = pooled.reshape(pooled.shape[0], -1)                            # (R, ps*ps*Croi)
        obj0 = jnp.pad(obj0, ((0, 0), (0, self.kobj_pad - obj0.shape[1]))
                       ).astype(jnp.bfloat16)                                 # lane-dense K

        # Appearance projection hoisted out of the per-ROI kernel: B rows only,
        # NHWC-flattened bf16 feature @ permuted bf16 weight, then row-repeat.
        app_flat = feats_nhwc[-1].reshape(feats_nhwc[-1].shape[0], -1)        # (B, h_flat) bf16
        app_proj = jnp.dot(app_flat, p['app_proj_w'],
                           preferred_element_type=jnp.float32)                # (B, 128) f32
        repeats = np.asarray(num_real_nodes) * nf
        app_proj_rep = jnp.repeat(app_proj, repeats, axis=0)                  # (R, 128)

        # one fused Pallas call for conv -> linear -> regressor -> fuse(+app_proj)
        fused = roi_chain(obj0, app_proj_rep, p)[:, :self.roi_out]            # (R, roi_out)
        fused = fused[:, None, :]                                             # unsqueeze(1)
        out['objects_feature'] = jnp.concatenate(jnp.split(fused, nf, axis=0), axis=1)
        return out


# ----------------------------------------------------------------------------
if __name__ == "__main__":
    train_params = {'input_size': (32, 32), 'num_input_frames': 2}
    enc = AppearanceEncoderPallas(
        train_params=train_params, block_expansion=8, num_down_blocks=3,
        max_expansion=64, pooling_after=2, padding_mode='zeros', pool_size=3,
        scale_factor=1, image_channel=3, seg_channel_bg=1, seg_channel_fg=1,
        instance_channel=1, flow_channel=2, occlusion_channel=1,
        key=jax.random.PRNGKey(0))

    key = jax.random.PRNGKey(0)
    k1, k2 = jax.random.split(key)
    B, N = 2, 4
    in_ch = (3 + 1 + 1 + 1) * 2 + (2 + 1) * 1                     # 15
    first_frame = jax.random.normal(k1, (B, in_ch, 32, 32), jnp.float32)
    batch_idx = jnp.array([0, 0, 1, 1], jnp.int32)                # node -> graph
    num_real_nodes = np.array([2, 2], np.int64)
    # rois in input-image coordinates (x1, y1, x2, y2), shape (N, num_frames, 4)
    base = jax.random.uniform(k2, (N, 2, 2), minval=2.0, maxval=14.0)
    rois = jnp.concatenate([base, base + 12.0], axis=-1)

    out = enc.forward(first_frame, batch_idx, rois, num_real_nodes)
    jax.block_until_ready(out['objects_feature'])

    assert out['enco0'].shape == (B, 16, 16, 16)
    assert out['enco1'].shape == (B, 32, 8, 8)
    assert out['app_encoded'].shape == (B, 32, 4, 4)
    assert out['objects_feature'].shape == (N, 2, 32)
    print("KERNEL_OK")
</pallas_src>

<mosaic_0001>
module attributes {stable_mosaic.version = 11 : i64} {
  func.func @_mm_bias_relu_kernel(%arg0: i32, %arg1: memref<256x256xbf16, #tpu.memory_space<vmem>>, %arg2: memref<256x128xbf16, #tpu.memory_space<vmem>>, %arg3: memref<1x128xf32, #tpu.memory_space<vmem>>, %arg4: memref<256x128xbf16, #tpu.memory_space<vmem>>) attributes {dimension_semantics = [#tpu.dimension_semantics<parallel>], iteration_bounds = array<i64: 2>, scalar_prefetch = 0 : i64, scratch_operands = 0 : i64, tpu.core_type = #tpu.core_type<tc>, window_params = [{transform_indices = @transform_0, window_bounds = array<i64: 256, 256>}, {pipeline_mode = #tpu.pipeline_mode<synchronous>, transform_indices = @transform_1, window_bounds = array<i64: 256, 128>}, {pipeline_mode = #tpu.pipeline_mode<synchronous>, transform_indices = @transform_2, window_bounds = array<i64: 1, 128>}, {transform_indices = @transform_3, window_bounds = array<i64: 256, 128>}]} {
    %c0 = arith.constant 0 : index
    %c0_0 = arith.constant 0 : index
    %0 = vector.load %arg1[%c0, %c0_0] : memref<256x256xbf16, #tpu.memory_space<vmem>>, vector<256x256xbf16>
    %c0_1 = arith.constant 0 : index
    %c0_2 = arith.constant 0 : index
    %1 = vector.load %arg2[%c0_1, %c0_2] : memref<256x128xbf16, #tpu.memory_space<vmem>>, vector<256x128xbf16>
    %cst = arith.constant dense<0.000000e+00> : vector<256x128xf32>
    %2 = tpu.matmul %0, %1, %cst {dimension_numbers = #tpu.dot_dimension_numbers<[1], [0], [0], [1], [0, 0, 1, 1], [], []>} : vector<256x256xbf16>, vector<256x128xbf16>, vector<256x128xf32> -> vector<256x128xf32>
    %c0_3 = arith.constant 0 : index
    %c0_4 = arith.constant 0 : index
    %3 = vector.load %arg3[%c0_3, %c0_4] : memref<1x128xf32, #tpu.memory_space<vmem>>, vector<1x128xf32>
    %4 = vector.broadcast %3 : vector<1x128xf32> to vector<256x128xf32>
    %5 = arith.addf %2, %4 : vector<256x128xf32>
    %cst_5 = arith.constant 0.000000e+00 : f32
    %6 = vector.broadcast %cst_5 : f32 to vector<256x128xf32>
    %7 = arith.maximumf %5, %6 : vector<256x128xf32>
    %8 = arith.truncf %7 : vector<256x128xf32> to vector<256x128xbf16>
    %c0_6 = arith.constant 0 : index
    %c0_7 = arith.constant 0 : index
    %9 = vector.load %arg4[%c0_6, %c0_7] : memref<256x128xbf16, #tpu.memory_space<vmem>>, vector<256x128xbf16>
    tpu.vector_store %arg4[%c0_6, %c0_7], %8 {strides = array<i32>} : memref<256x128xbf16, #tpu.memory_space<vmem>>, vector<256x128xbf16>,
    return
  }
  func.func @transform_0(%arg0: i32) -> (i32, i32) {
    %c0_i32 = arith.constant 0 : i32
    %c0_i32_0 = arith.constant 0 : i32
    return %arg0, %c0_i32 : i32, i32
  }
  func.func @transform_1(%arg0: i32) -> (i32, i32) {
    %c0_i32 = arith.constant 0 : i32
    %c0_i32_0 = arith.constant 0 : i32
    %c0_i32_1 = arith.constant 0 : i32
    return %c0_i32, %c0_i32_0 : i32, i32
  }
  func.func @transform_2(%arg0: i32) -> (i32, i32) {
    %c0_i32 = arith.constant 0 : i32
    %c0_i32_0 = arith.constant 0 : i32
    %c0_i32_1 = arith.constant 0 : i32
    return %c0_i32, %c0_i32_0 : i32, i32
  }
  func.func @transform_3(%arg0: i32) -> (i32, i32) {
    %c0_i32 = arith.constant 0 : i32
    %c0_i32_0 = arith.constant 0 : i32
    return %arg0, %c0_i32 : i32, i32
  }
}

</mosaic_0001>

<bundles_post_ra>
// kernel: tpu_custom_call.1
= control target key start
LH: loop header
LB: loop body
LE: loop exit
PB: predicated region body
PF: predicated region fallthrough
CT: control target
= control target key end

     0   :  { %8 = vsyncpa [#allocation3], 0  ;;  %s1765_s0 = inlined_call_operand.hbm [shape: bf16[512,256], index: 0, kind: input, shape index: {}]   ;;  %s1766_s1 = inlined_call_operand.hbm [shape: bf16[256,128], index: 1, kind: input, shape index: {}]   ;;  %s1767_s2 = inlined_call_operand.vmem [shape: f32[1,128], index: 2, kind: input, shape index: {}]   ;;  %s1768_s3 = inlined_call_operand.hbm [shape: bf16[512,128], index: 3, kind: output, shape index: {}]  }
   0x1   :  { %10 = vsyncpa [#allocation3 + $0x1], 0 }
   0x2   :  { %11 = vsyncpa [#allocation6], 0 }
   0x3   :  { %12 = vsyncpa [#allocation4], 0 }
   0x4   :  { %14 = vsyncpa [#allocation4 + $0x1], 0  ;;  %s1502_s12 = smov 0   ;;  %s1504_s13 = smov 0  }
   0x5   :  { %s1506_s14 = smov 0   ;;  %s1508_s15 = smov 0  }
   0x6 LB: > { %s1523_s16 = sadd.s32 4294967295, %s1473_s15   ;;  %s908_s17 = sadd.s32 4294967294, %s1473_s15   ;;  %s1473_s15 = sphi %s1508_s15, %s1778_s15   ;;  %s1469_s14 = sphi %s1506_s14, %s1777_s14   ;;  %s1465_s13 = sphi %s1504_s13, %s1776_s13   ;;  %s1461_s12 = sphi %s1502_s12, %s1775_s12  }
   0x7   : > { %p40_p0 = scmp.ne.s32.totalorder %s1465_s13, %s1461_s12  ;;  %p41_p1 = scmp.eq.s32.totalorder %s1523_s16, 0 }
   0x8   : > { %p106_p2 = scmp.eq.s32.totalorder %s1523_s16, 1  ;;  %p112_p3 = scmp.eq.s32.totalorder %s908_s17, 1 }
   0x9   : > { %p1532_p4 = por %p41_p1, %p40_p0  ;;  %p909_p5 = scmp.ge.s32.totalorder %s1473_s15, 1 }
   0xa   : > { %p1537_p6 = por %p112_p3, %p40_p0  ;;  %p119_p7 = scmp.lt.s32.totalorder %s1473_s15, 3 }
   0xb   : > { %s130_s22 = sshll.u32 %s1766_s1, 4  ;;  %s1475_s24 = smov [#allocation5]   ;;  %s131_s22 = int_to_ptr.hbm [resolvable:$true] %s130_s22 }
   0xc   : > { %p1545_p8 = pnand %p909_p5, %p119_p7  ;;  %s132_s25 = sshll.u32 %s1475_s24, 4  ;;  %s133_s25 = int_to_ptr.vmem [resolvable:$true] %s132_s25 }
   0xd   : > { %s1555_s26 = sadd.s32 1, %s1473_s15   ;;  %s1476_s27 = smov 64  }
   0xe   : > { %p1287_p9 = pneg %p1545_p8  ;;  %s1477_s28 = smov 4  }
   0xf   : > { %s24_s29 = ssub.s32 %s1473_s15, %s1555_s26  ;;  %s27_s30 = sadd.s32 1, %s1469_s14 }
  0x10   : > { %p1288_p10 = pnand %p1287_p9, %p41_p1  ;;  %p25_p12 = scmp.eq.s32.totalorder %s24_s29, 0 }
  0x11   : > { %p34_p13 = scmp.ne.s32.totalorder %s1469_s14, %s1465_s13  ;;  %p35_p0 = scmp.eq.s32.totalorder %s1473_s15, 0 }
  0x12   : > { %1290 = dma.hbm_to_vmem [thread:$0]  (!%p1288_p10), %s131_s22, 2048, %s133_s25, [#allocation6], %s1476_s27, %s1476_s27, %s1477_s28  }
  0x13   : > { %p1300_p3 = scmp.lt.s32.totalorder %s1473_s15, 2  ;;  %p36_p5 = por %p35_p0, %p34_p13 }
  0x14   : > { %s1565_s4 = scalar_select %p25_p12, %s1469_s14, %s27_s30  }
  0x15   : > { %p1569_p7 = por %p106_p2, %p34_p13  ;;  %s149_s6 = sand.u32 1, %s1469_s14  }
  0x16   : > { %s1118_s7 = sshll.u32 %s1473_s15, 8  ;;  %s912_s8 = sshll.u32 %s149_s6, 8 }
  0x17   : > { %s159_s11 = scalar_lea.hbm %s1765_s0, %s1118_s7  ;;  %s153_s20 = scalar_lea.vmem [#allocation2], %s912_s8 }
  0x18   : > { %s160_s17 = sshll.u32 %s159_s11, 4  ;;  %s162_s21 = sshll.u32 %s153_s20, 4  ;;  %s161_s17 = int_to_ptr.hbm [resolvable:$true] %s160_s17  ;;  %s163_s21 = int_to_ptr.vmem [resolvable:$true] %s162_s21 }
  0x19   : > { %p1580_p9 = pnand %p1300_p3, %p36_p5  ;;  %s150_s24 = scalar_lea.sflag [#allocation3], %s149_s6 }
  0x1a   : > { %s1373_s25 = sshra.s32 %s161_s17, 4  ;;  %s1380_s30 = scalar_lea.hbm %s1765_s0, 512  ;;  %s1374_s25 = int_to_ptr.hbm [resolvable:$true] %s1373_s25 }
  0x1b   : > { %s1375_s27 = scalar_lea.hbm %s1374_s25, 256  ;;  %p1377_p10 = pneg %p1580_p9 }
  0x1c   : > { %p1376_p2 = scmp.ne.s32.totalorder %s1374_s25, %s1375_s27  ;;  %p1381_p0 = scmp.lt.s32.totalorder %s1374_s25, %s1765_s0 }
  0x1d   : > { %p1382_p3 = scmp.lt.s32.totalorder %s1380_s30, %s1375_s27 }
  0x1e   : > { %p1378_p12 = pnand %p1377_p10, %p1376_p2 }
  0x1f   : > { %p1383_p5 = por %p1382_p3, %p1381_p0 }
  0x20   : > { %p1379_p13 = pneg %p1378_p12 }
  0x22   : > { %p1384_p11 = pnand %p1383_p5, %p1379_p13 }
  0x24   : > { %1387 = shalt.err (!%p1384_p11)
}
  0x25   : > { %s1478_s6 = smov 128   ;;  %s1479_s9 = smov 8  }
  0x26   : > { %1294 = dma.hbm_to_vmem [thread:$0]  (!%p1580_p9), %s161_s17, 4096, %s163_s21, %s150_s24, %s1478_s6, %s1478_s6, %s1479_s9  }
  0x27   : > { %174 = sbr.rel (%p1545_p8) target bundleno = 343 (0x157), region = 32  ;;  %s1597_s10 = sand.u32 (!%p1545_p8), 1, %s1465_s13  }
  0x28   : > { %s917_s11 = sshll.u32 (!%p1545_p8), %s1597_s10, 8  ;;  %s177_s20 = scalar_lea.sflag (!%p1545_p8), [#allocation3], %s1597_s10 }
  0x29   : > { %s1601_s25 = scalar_lea.vmem (!%p1545_p8), [#allocation2], %s917_s11 }
  0x2c   : > { %1448 = dma.done.wait (%p1532_p4), %s177_s20, 4096  }
  0x2d   : > { %1450 = vsyncadd (%p1532_p4), %s177_s20, 4294963200 }
  0x2e   : > { %1452 = dma.done.wait (%p41_p1), [#allocation6], 2048  }
  0x2f   : > { %1454 = vsyncadd (%p41_p1), [#allocation6], 4294965248  ;;  %v1158_v0 = vld [vmem:[#allocation5 + $0x38] sm:$0xff]  ;;  %v1157_v2 = vld [vmem:[#allocation5 + $0x30] sm:$0xff]  ;;  %s919_s17 = sshll.u32 %s1597_s10, 7  ;;  %s1167_s22 = sshll.u32 %s1523_s16, 7 }
  0x30   : > { %v1166_v1 = vld [vmem:[#allocation5 + $0x78] sm:$0xff]  ;;  %535 = vmatpush.bf16.msra.mxu0 %v1158_v0  ;;  %1263 = vmatpush.bf16.msra.mxu2 %v1158_v0  ;;  %v1165_v3 = vld [vmem:[#allocation5 + $0x70] sm:$0xff]  ;;  %v1156_v4 = vld [vmem:[#allocation5 + $0x28] sm:$0xff]  ;;  %s1685_s21 = scalar_lea.vmem [#allocation7], %s919_s17  ;;  %s821_s28 = scalar_lea.hbm %s1768_s3, %s1167_s22 }
  0x31   : > { %624 = vmatpush.bf16.msra.mxu1 %v1166_v1  ;;  %1271 = vmatpush.bf16.msra.mxu3 %v1166_v1  ;;  %v1164_v5 = vld [vmem:[#allocation5 + $0x68] sm:$0xff]  ;;  %v1155_v6 = vld [vmem:[#allocation5 + $0x20] sm:$0xff]  ;;  %v1154_v8 = vld [vmem:[#allocation5 + $0x18] sm:$0xff]  ;;  %s822_s29 = sshll.u32 %s1685_s21, 4  ;;  %s824_s30 = sshll.u32 %s821_s28, 4  ;;  %s823_s29 = int_to_ptr.vmem [resolvable:$true] %s822_s29  ;;  %s825_s30 = int_to_ptr.hbm [resolvable:$true] %s824_s30 }
  0x32   : > { %v1163_v7 = vld [vmem:[#allocation5 + $0x60] sm:$0xff]  ;;  %v1162_v9 = vld [vmem:[#allocation5 + $0x58] sm:$0xff]  ;;  %v1153_v10 = vld [vmem:[#allocation5 + $0x10] sm:$0xff]  ;;  %s810_s16 = scalar_lea.sflag [#allocation4], %s1597_s10  ;;  %s1417_s7 = sshra.s32 %s825_s30, 4  ;;  %s1418_s7 = int_to_ptr.hbm [resolvable:$true] %s1417_s7 }
  0x33   : > { %v1161_v11 = vld [vmem:[#allocation5 + $0x50] sm:$0xff]  ;;  %v1152_v12 = vld [vmem:[#allocation5 + $0x8] sm:$0xff]  ;;  %v1151_v14 = vld [vmem:[#allocation5] sm:$0xff]  ;;  %s1419_s8 = scalar_lea.hbm %s1418_s7, 128  ;;  %s1423_s11 = scalar_lea.hbm %s1768_s3, 256 }
  0x34   : > { %536 = vmatpush.bf16.msra.mxu0 %v1157_v2  ;;  %1264 = vmatpush.bf16.msra.mxu2 %v1157_v2  ;;  %v1160_v13 = vld [vmem:[#allocation5 + $0x48] sm:$0xff]  ;;  %v1159_v15 = vld [vmem:[#allocation5 + $0x40] sm:$0xff]  ;;  %v930_v28 = vld [vmem:[%s1601_s25 + $0x10] sm:$0xf]  ;;  %p1420_p1 = scmp.ne.s32.totalorder %s1418_s7, %s1419_s8  ;;  %p1424_p11 = scmp.lt.s32.totalorder %s1418_s7, %s1768_s3 }
  0x35   : > { %625 = vmatpush.bf16.msra.mxu1 %v1165_v3  ;;  %1272 = vmatpush.bf16.msra.mxu3 %v1165_v3  ;;  %v922_v16 = vld [vmem:[%s1601_s25] sm:$0xf]  ;;  %v1120_v17 = vld [vmem:[%s1601_s25 + $0x4] sm:$0xf0]  ;;  %v1119_v20 = vld [vmem:[%s1601_s25 + $0x4] sm:$0xf]  ;;  %p1425_p9 = scmp.lt.s32.totalorder %s1423_s11, %s1419_s8 }
  0x36   : > { %v986_v18 = vld [vmem:[%s1601_s25 + $0x80] sm:$0xf]  ;;  %v1136_v19 = vld [vmem:[%s1601_s25 + $0x84] sm:$0xf0]  ;;  %v924_v21 = vld [vmem:[%s1601_s25 + $0x8] sm:$0xf0]  ;;  %v923_v24 = vor.u32 %v1120_v17, %v922_v16  ;;  %p1421_p4 = pnand %p1420_p1, %p1569_p7 }
  0x37   : > { %v1135_v22 = vld [vmem:[%s1601_s25 + $0x84] sm:$0xf]  ;;  %v988_v23 = vld [vmem:[%s1601_s25 + $0x88] sm:$0xf0]  ;;  %v987_v25 = vor.u32 %v1136_v19, %v986_v18  ;;  %v927_v26 = vor.u32 %v1119_v20, %v924_v21  ;;  %v1122_v29 = vld [vmem:[%s1601_s25 + $0x14] sm:$0xf0]  ;;  %p1426_p2 = por %p1425_p9, %p1424_p11 }
  0x38   : > { %537 = vmatpush.bf16.msra.mxu0 %v1156_v4  ;;  %1265 = vmatpush.bf16.msra.mxu2 %v1156_v4  ;;  %v991_v27 = vor.u32 %v1135_v22, %v988_v23  ;;  %v994_v30 = vld [vmem:[%s1601_s25 + $0x90] sm:$0xf]  ;;  %v1138_v31 = vld [vmem:[%s1601_s25 + $0x94] sm:$0xf0]  ;;  %v1121_v32 = vld [vmem:[%s1601_s25 + $0x14] sm:$0xf]  ;;  %v931_v36 = vor.u32 %v1122_v29, %v930_v28  ;;  %p1422_p8 = pneg %p1421_p4 }
  0x39   : > { %626 = vmatpush.bf16.msra.mxu1 %v1164_v5  ;;  %1273 = vmatpush.bf16.msra.mxu3 %v1164_v5  ;;  %v932_v33 = vld [vmem:[%s1601_s25 + $0x18] sm:$0xf0]  ;;  %v1137_v34 = vld [vmem:[%s1601_s25 + $0x94] sm:$0xf]  ;;  %v995_v37 = vor.u32 %v1138_v31, %v994_v30  ;;  %v938_v40 = vld [vmem:[%s1601_s25 + $0x20] sm:$0xf] }
  0x3a   : > { %v996_v35 = vld [vmem:[%s1601_s25 + $0x98] sm:$0xf0]  ;;  %v935_v38 = vor.u32 %v1121_v32, %v932_v33  ;;  %v1124_v41 = vld [vmem:[%s1601_s25 + $0x24] sm:$0xf0]  ;;  %v1002_v42 = vld [vmem:[%s1601_s25 + $0xa0] sm:$0xf]  ;;  %p1427_p10 = pnand %p1426_p2, %p1422_p8 }
  0x3b   : > { %v999_v39 = vor.u32 %v1137_v34, %v996_v35  ;;  %v1140_v43 = vld [vmem:[%s1601_s25 + $0xa4] sm:$0xf0]  ;;  %v1123_v44 = vld [vmem:[%s1601_s25 + $0x24] sm:$0xf]  ;;  %v940_v45 = vld [vmem:[%s1601_s25 + $0x28] sm:$0xf0]  ;;  %v939_v48 = vor.u32 %v1124_v41, %v938_v40 }
  0x3c   : > { %538 = vmatpush.bf16.msra.mxu0 %v1155_v6  ;;  %1266 = vmatpush.bf16.msra.mxu2 %v1155_v6  ;;  %v1139_v46 = vld [vmem:[%s1601_s25 + $0xa4] sm:$0xf]  ;;  %v1004_v47 = vld [vmem:[%s1601_s25 + $0xa8] sm:$0xf0]  ;;  %v1003_v49 = vor.u32 %v1140_v43, %v1002_v42  ;;  %v943_v50 = vor.u32 %v1123_v44, %v940_v45  ;;  %v946_v52 = vld [vmem:[%s1601_s25 + $0x30] sm:$0xf] }
  0x3d   : > { %627 = vmatpush.bf16.msra.mxu1 %v1163_v7  ;;  %1274 = vmatpush.bf16.msra.mxu3 %v1163_v7  ;;  %v1007_v51 = vor.u32 %v1139_v46, %v1004_v47  ;;  %v1126_v53 = vld [vmem:[%s1601_s25 + $0x34] sm:$0xf0]  ;;  %v1010_v54 = vld [vmem:[%s1601_s25 + $0xb0] sm:$0xf]  ;;  %v1125_v56 = vld [vmem:[%s1601_s25 + $0x34] sm:$0xf] }
  0x3e   : > { %v1142_v55 = vld [vmem:[%s1601_s25 + $0xb4] sm:$0xf0]  ;;  %v948_v57 = vld [vmem:[%s1601_s25 + $0x38] sm:$0xf0]  ;;  %v1141_v58 = vld [vmem:[%s1601_s25 + $0xb4] sm:$0xf]  ;;  %v947_v60 = vor.u32 %v1126_v53, %v946_v52 }
  0x3f   : > { %v1012_v59 = vld [vmem:[%s1601_s25 + $0xb8] sm:$0xf0]  ;;  %v1011_v61 = vor.u32 %v1142_v55, %v1010_v54  ;;  %v951_v62 = vor.u32 %v1125_v56, %v948_v57  ;;  %v954_v0 = vld [vmem:[%s1601_s25 + $0x40] sm:$0xf]  ;;  %v1128_v1 = vld [vmem:[%s1601_s25 + $0x44] sm:$0xf0] }
  0x40   : > { %539 = vmatpush.bf16.msra.mxu0 %v1154_v8  ;;  %1267 = vmatpush.bf16.msra.mxu2 %v1154_v8  ;;  %v1015_v63 = vor.u32 %v1141_v58, %v1012_v59  ;;  %v1018_v2 = vld [vmem:[%s1601_s25 + $0xc0] sm:$0xf]  ;;  %v1144_v3 = vld [vmem:[%s1601_s25 + $0xc4] sm:$0xf0]  ;;  %v1127_v4 = vld [vmem:[%s1601_s25 + $0x44] sm:$0xf]  ;;  %v955_v8 = vor.u32 %v1128_v1, %v954_v0 }
  0x41   : > { %628 = vmatpush.bf16.msra.mxu1 %v1162_v9  ;;  %1275 = vmatpush.bf16.msra.mxu3 %v1162_v9  ;;  %v956_v5 = vld [vmem:[%s1601_s25 + $0x48] sm:$0xf0]  ;;  %v1143_v6 = vld [vmem:[%s1601_s25 + $0xc4] sm:$0xf]  ;;  %v1019_v9 = vor.u32 %v1144_v3, %v1018_v2  ;;  %v1129_v16 = vld [vmem:[%s1601_s25 + $0x54] sm:$0xf] }
  0x42   : > { %v1020_v7 = vld [vmem:[%s1601_s25 + $0xc8] sm:$0xf0]  ;;  %v964_v17 = vld [vmem:[%s1601_s25 + $0x58] sm:$0xf0]  ;;  %v1145_v18 = vld [vmem:[%s1601_s25 + $0xd4] sm:$0xf] }
  0x43   : > { %v1028_v19 = vld [vmem:[%s1601_s25 + $0xd8] sm:$0xf0]  ;;  %v967_v22 = vor.u32 %v1129_v16, %v964_v17  ;;  %v1131_v28 = vld [vmem:[%s1601_s25 + $0x64] sm:$0xf]  ;;  %v972_v29 = vld [vmem:[%s1601_s25 + $0x68] sm:$0xf0] }
  0x44   : > { %540 = vmatpush.bf16.msra.mxu0 %v1153_v10  ;;  %1268 = vmatpush.bf16.msra.mxu2 %v1153_v10  ;;  %v959_v10 = vor.u32 %v1127_v4, %v956_v5  ;;  %v1031_v23 = vor.u32 %v1145_v18, %v1028_v19  ;;  %v1147_v30 = vld [vmem:[%s1601_s25 + $0xe4] sm:$0xf]  ;;  %v1036_v31 = vld [vmem:[%s1601_s25 + $0xe8] sm:$0xf0]  ;;  %v975_v34 = vor.u32 %v1131_v28, %v972_v29  ;;  %v1133_v40 = vld [vmem:[%s1601_s25 + $0x74] sm:$0xf] }
  0x45   : > { %629 = vmatpush.bf16.msra.mxu1 %v1161_v11  ;;  %1276 = vmatpush.bf16.msra.mxu3 %v1161_v11  ;;  %v1023_v11 = vor.u32 %v1143_v6, %v1020_v7  ;;  %v1039_v35 = vor.u32 %v1147_v30, %v1036_v31  ;;  %v980_v41 = vld [vmem:[%s1601_s25 + $0x78] sm:$0xf0]  ;;  %v1149_v42 = vld [vmem:[%s1601_s25 + $0xf4] sm:$0xf] }
  0x46   : > { %v1044_v43 = vld [vmem:[%s1601_s25 + $0xf8] sm:$0xf0]  ;;  %v983_v46 = vor.u32 %v1133_v40, %v980_v41 }
  0x47   : > { %v1047_v47 = vor.u32 %v1149_v42, %v1044_v43 }
  0x48   : > { %541 = vmatpush.bf16.msra.mxu0 %v1152_v12  ;;  %1269 = vmatpush.bf16.msra.mxu2 %v1152_v12  ;;  %v962_v12 = vld [vmem:[%s1601_s25 + $0x50] sm:$0xf] }
  0x49   : > { %630 = vmatpush.bf16.msra.mxu1 %v1160_v13  ;;  %1277 = vmatpush.bf16.msra.mxu3 %v1160_v13  ;;  %v1130_v13 = vld [vmem:[%s1601_s25 + $0x54] sm:$0xf0] }
  0x4a   : > { %v963_v20 = vor.u32 %v1130_v13, %v962_v12 }
  0x4c   : > { %542 = vmatpush.bf16.msra.mxu0 %v1151_v14  ;;  %1270 = vmatpush.bf16.msra.mxu2 %v1151_v14  ;;  %v1026_v14 = vld [vmem:[%s1601_s25 + $0xd0] sm:$0xf] }
  0x4d   : > { %631 = vmatpush.bf16.msra.mxu1 %v1159_v15  ;;  %1278 = vmatpush.bf16.msra.mxu3 %v1159_v15  ;;  %v1146_v15 = vld [vmem:[%s1601_s25 + $0xd4] sm:$0xf0] }
  0x4e   : > { %v1027_v21 = vor.u32 %v1146_v15, %v1026_v14 }
  0x4f   : > { %543 = vmatmul.bf16.vlgmr.msra.gmra.mxu0 %v923_v24  ;;  %583 = vmatmul.bf16.vlgmr.msra.gmra.mxu2 %v987_v25  ;;  %v970_v24 = vld [vmem:[%s1601_s25 + $0x60] sm:$0xf]  ;;  %v1132_v25 = vld [vmem:[%s1601_s25 + $0x64] sm:$0xf0] }
  0x50   : > { %632 = vmatmul.bf16.vlgmr.msra.gmra.mxu1 %v927_v26  ;;  %672 = vmatmul.bf16.vlgmr.msra.gmra.mxu3 %v991_v27  ;;  %v1034_v26 = vld [vmem:[%s1601_s25 + $0xe0] sm:$0xf]  ;;  %v1148_v27 = vld [vmem:[%s1601_s25 + $0xe4] sm:$0xf0]  ;;  %v971_v32 = vor.u32 %v1132_v25, %v970_v24 }
  0x51   : > { %v1035_v33 = vor.u32 %v1148_v27, %v1034_v26 }
  0x5f   : > { %548 = vmatmul.bf16.gmra.mxu0 %v931_v36  ;;  %588 = vmatmul.bf16.gmra.mxu2 %v995_v37  ;;  %v978_v36 = vld [vmem:[%s1601_s25 + $0x70] sm:$0xf]  ;;  %v1134_v37 = vld [vmem:[%s1601_s25 + $0x74] sm:$0xf0] }
  0x60   : > { %637 = vmatmul.bf16.gmra.mxu1 %v935_v38  ;;  %677 = vmatmul.bf16.gmra.mxu3 %v999_v39  ;;  %v1042_v38 = vld [vmem:[%s1601_s25 + $0xf0] sm:$0xf]  ;;  %v1150_v39 = vld [vmem:[%s1601_s25 + $0xf4] sm:$0xf0]  ;;  %v979_v44 = vor.u32 %v1134_v37, %v978_v36 }
  0x61   : > { %v1043_v45 = vor.u32 %v1150_v39, %v1042_v38 }
  0x6f   : > { %553 = vmatmul.bf16.gmra.mxu0 %v939_v48  ;;  %593 = vmatmul.bf16.gmra.mxu2 %v1003_v49  ;;  %v1678_v49 = vld [vmem:[%s1767_s2] ss:$0 sm:$0xff] }
  0x70   : > { %642 = vmatmul.bf16.gmra.mxu1 %v943_v50  ;;  %682 = vmatmul.bf16.gmra.mxu3 %v1007_v51 }
  0x7f   : > { %558 = vmatmul.bf16.gmra.mxu0 %v947_v60  ;;  %598 = vmatmul.bf16.gmra.mxu2 %v1011_v61 }
  0x80   : > { %647 = vmatmul.bf16.gmra.mxu1 %v951_v62  ;;  %687 = vmatmul.bf16.gmra.mxu3 %v1015_v63 }
  0x8f   : > { %563 = vmatmul.bf16.gmra.mxu0 %v955_v8  ;;  %603 = vmatmul.bf16.gmra.mxu2 %v1019_v9 }
  0x90   : > { %652 = vmatmul.bf16.gmra.mxu1 %v959_v10  ;;  %692 = vmatmul.bf16.gmra.mxu3 %v1023_v11 }
  0x9f   : > { %568 = vmatmul.bf16.gmra.mxu0 %v963_v20  ;;  %608 = vmatmul.bf16.gmra.mxu2 %v1027_v21 }
  0xa0   : > { %657 = vmatmul.bf16.gmra.mxu1 %v967_v22  ;;  %697 = vmatmul.bf16.gmra.mxu3 %v1031_v23 }
  0xaf   : > { %573 = vmatmul.bf16.gmra.mxu0 %v971_v32  ;;  %613 = vmatmul.bf16.gmra.mxu2 %v1035_v33 }
  0xb0   : > { %662 = vmatmul.bf16.gmra.mxu1 %v975_v34  ;;  %702 = vmatmul.bf16.gmra.mxu3 %v1039_v35 }
  0xbf   : > { %578 = vmatmul.bf16.gmra.mxu0 %v979_v44  ;;  %618 = vmatmul.bf16.gmra.mxu2 %v1043_v45 }
  0xc0   : > { %667 = vmatmul.bf16.gmra.mxu1 %v983_v46  ;;  %707 = vmatmul.bf16.gmra.mxu3 %v1047_v47 }
  0xcc   : > { %v544_v48 = vpop.f32.mrf.mxu0 }
  0xcd   : > { %v633_v50 = vpop.f32.mrf.mxu1  ;;  %v545_v51 = vadd.f32 %v1678_v49, %v544_v48 }
  0xcf   : > { %v634_v55 = vadd.f32 %v633_v50, %v545_v51 }
  0xd1   : > { %v713_v60 = vmax.f32 %v634_v55, 0.0 }
  0xd2   : > { %v584_v52 = vpop.f32.mrf.mxu2 }
  0xd3   : > { %v673_v53 = vpop.f32.mrf.mxu3  ;;  %v585_v58 = vadd.f32 %v1678_v49, %v584_v52 }
  0xd4   : > { %v546_v54 = vpop.f32.mrf.mxu0 }
  0xd5   : > { %v547_v56 = vadd.f32 %v1678_v49, %v546_v54  ;;  %v635_v57 = vpop.f32.mrf.mxu1  ;;  %v674_v63 = vadd.f32 %v673_v53, %v585_v58 }
  0xd7   : > { %v636_v59 = vadd.f32 %v635_v57, %v547_v56  ;;  %v729_v6 = vmax.f32 %v674_v63, 0.0 }
  0xd9   : > { %v714_v61 = vmax.f32 %v636_v59, 0.0 }
  0xda   : > { %v586_v62 = vpop.f32.mrf.mxu2 }
  0xdb   : > { %v1171_v0 = vpack.c.bf16 %v714_v61, %v713_v60  ;;  %v587_v1 = vadd.f32 %v1678_v49, %v586_v62  ;;  %v675_v2 = vpop.f32.mrf.mxu3 }
  0xdc   : > { %v549_v3 = vpop.f32.mrf.mxu0 }
  0xdd   : > { %1172 = vst [vmem:[%s1685_s21] sm:$0xff] %v1171_v0   ;;  %v676_v4 = vadd.f32 %v675_v2, %v587_v1  ;;  %v638_v5 = vpop.f32.mrf.mxu1  ;;  %v550_v9 = vadd.f32 %v1678_v49, %v549_v3 }
  0xdf   : > { %v730_v7 = vmax.f32 %v676_v4, 0.0  ;;  %v639_v13 = vadd.f32 %v638_v5, %v550_v9 }
  0xe1   : > { %v1211_v8 = vpack.c.bf16 %v730_v7, %v729_v6  ;;  %v715_v18 = vmax.f32 %v639_v13, 0.0 }
  0xe2   : > { %v589_v10 = vpop.f32.mrf.mxu2 }
  0xe3   : > { %1255 = vst [vmem:[%s1685_s21 + $0x40] sm:$0xff] %v1211_v8   ;;  %v678_v11 = vpop.f32.mrf.mxu3  ;;  %v590_v16 = vadd.f32 %v1678_v49, %v589_v10 }
  0xe4   : > { %v551_v12 = vpop.f32.mrf.mxu0 }
  0xe5   : > { %v552_v14 = vadd.f32 %v1678_v49, %v551_v12  ;;  %v640_v15 = vpop.f32.mrf.mxu1  ;;  %v679_v21 = vadd.f32 %v678_v11, %v590_v16 }
  0xe7   : > { %v641_v17 = vadd.f32 %v640_v15, %v552_v14  ;;  %v731_v28 = vmax.f32 %v679_v21, 0.0 }
  0xe9   : > { %v716_v19 = vmax.f32 %v641_v17, 0.0 }
  0xea   : > { %v591_v20 = vpop.f32.mrf.mxu2 }
  0xeb   : > { %v1176_v22 = vpack.c.bf16 %v716_v19, %v715_v18  ;;  %v592_v23 = vadd.f32 %v1678_v49, %v591_v20  ;;  %v680_v24 = vpop.f32.mrf.mxu3 }
  0xec   : > { %v554_v25 = vpop.f32.mrf.mxu0 }
  0xed   : > { %1248 = vst [vmem:[%s1685_s21 + $0x8] sm:$0xff] %v1176_v22   ;;  %v681_v26 = vadd.f32 %v680_v24, %v592_v23  ;;  %v643_v27 = vpop.f32.mrf.mxu1  ;;  %v555_v31 = vadd.f32 %v1678_v49, %v554_v25 }
  0xef   : > { %v732_v29 = vmax.f32 %v681_v26, 0.0  ;;  %v644_v35 = vadd.f32 %v643_v27, %v555_v31 }
  0xf1   : > { %v1216_v30 = vpack.c.bf16 %v732_v29, %v731_v28  ;;  %v717_v40 = vmax.f32 %v644_v35, 0.0 }
  0xf2   : > { %v594_v32 = vpop.f32.mrf.mxu2 }
  0xf3   : > { %1256 = vst [vmem:[%s1685_s21 + $0x48] sm:$0xff] %v1216_v30   ;;  %v683_v33 = vpop.f32.mrf.mxu3  ;;  %v595_v38 = vadd.f32 %v1678_v49, %v594_v32 }
  0xf4   : > { %v556_v34 = vpop.f32.mrf.mxu0 }
  0xf5   : > { %v557_v36 = vadd.f32 %v1678_v49, %v556_v34  ;;  %v645_v37 = vpop.f32.mrf.mxu1  ;;  %v684_v43 = vadd.f32 %v683_v33, %v595_v38 }
  0xf7   : > { %v646_v39 = vadd.f32 %v645_v37, %v557_v36  ;;  %v733_v51 = vmax.f32 %v684_v43, 0.0 }
  0xf9   : > { %v718_v41 = vmax.f32 %v646_v39, 0.0 }
  0xfa   : > { %v596_v42 = vpop.f32.mrf.mxu2 }
  0xfb   : > { %v1181_v44 = vpack.c.bf16 %v718_v41, %v717_v40  ;;  %v597_v45 = vadd.f32 %v1678_v49, %v596_v42  ;;  %v685_v46 = vpop.f32.mrf.mxu3 }
  0xfc   : > { %v559_v47 = vpop.f32.mrf.mxu0 }
  0xfd   : > { %1249 = vst [vmem:[%s1685_s21 + $0x10] sm:$0xff] %v1181_v44   ;;  %v686_v48 = vadd.f32 %v685_v46, %v597_v45  ;;  %v648_v50 = vpop.f32.mrf.mxu1  ;;  %v560_v54 = vadd.f32 %v1678_v49, %v559_v47 }
  0xff   : > { %v734_v52 = vmax.f32 %v686_v48, 0.0  ;;  %v649_v58 = vadd.f32 %v648_v50, %v560_v54 }
 0x101   : > { %v1221_v53 = vpack.c.bf16 %v734_v52, %v733_v51  ;;  %v719_v63 = vmax.f32 %v649_v58, 0.0 }
 0x102   : > { %v599_v55 = vpop.f32.mrf.mxu2 }
 0x103   : > { %1257 = vst [vmem:[%s1685_s21 + $0x50] sm:$0xff] %v1221_v53   ;;  %v688_v56 = vpop.f32.mrf.mxu3  ;;  %v600_v61 = vadd.f32 %v1678_v49, %v599_v55 }
 0x104   : > { %v561_v57 = vpop.f32.mrf.mxu0 }
 0x105   : > { %v562_v59 = vadd.f32 %v1678_v49, %v561_v57  ;;  %v650_v60 = vpop.f32.mrf.mxu1  ;;  %v689_v2 = vadd.f32 %v688_v56, %v600_v61 }
 0x107   : > { %v651_v62 = vadd.f32 %v650_v60, %v562_v59  ;;  %v735_v9 = vmax.f32 %v689_v2, 0.0 }
 0x109   : > { %v720_v0 = vmax.f32 %v651_v62, 0.0 }
 0x10a   : > { %v601_v1 = vpop.f32.mrf.mxu2 }
 0x10b   : > { %v1186_v3 = vpack.c.bf16 %v720_v0, %v719_v63  ;;  %v602_v4 = vadd.f32 %v1678_v49, %v601_v1  ;;  %v690_v5 = vpop.f32.mrf.mxu3 }
 0x10c   : > { %v564_v6 = vpop.f32.mrf.mxu0 }
 0x10d   : > { %1250 = vst [vmem:[%s1685_s21 + $0x18] sm:$0xff] %v1186_v3   ;;  %v691_v7 = vadd.f32 %v690_v5, %v602_v4  ;;  %v653_v8 = vpop.f32.mrf.mxu1  ;;  %v565_v12 = vadd.f32 %v1678_v49, %v564_v6 }
 0x10f   : > { %v736_v10 = vmax.f32 %v691_v7, 0.0  ;;  %v654_v16 = vadd.f32 %v653_v8, %v565_v12 }
 0x111   : > { %v1226_v11 = vpack.c.bf16 %v736_v10, %v735_v9  ;;  %v721_v21 = vmax.f32 %v654_v16, 0.0 }
 0x112   : > { %v604_v13 = vpop.f32.mrf.mxu2 }
 0x113   : > { %1258 = vst [vmem:[%s1685_s21 + $0x58] sm:$0xff] %v1226_v11   ;;  %v693_v14 = vpop.f32.mrf.mxu3  ;;  %v605_v19 = vadd.f32 %v1678_v49, %v604_v13 }
 0x114   : > { %v566_v15 = vpop.f32.mrf.mxu0 }
 0x115   : > { %v567_v17 = vadd.f32 %v1678_v49, %v566_v15  ;;  %v655_v18 = vpop.f32.mrf.mxu1  ;;  %v694_v24 = vadd.f32 %v693_v14, %v605_v19 }
 0x117   : > { %v656_v20 = vadd.f32 %v655_v18, %v567_v17  ;;  %v737_v31 = vmax.f32 %v694_v24, 0.0 }
 0x119   : > { %v722_v22 = vmax.f32 %v656_v20, 0.0 }
 0x11a   : > { %v606_v23 = vpop.f32.mrf.mxu2 }
 0x11b   : > { %v1191_v25 = vpack.c.bf16 %v722_v22, %v721_v21  ;;  %v607_v26 = vadd.f32 %v1678_v49, %v606_v23  ;;  %v695_v27 = vpop.f32.mrf.mxu3 }
 0x11c   : > { %v569_v28 = vpop.f32.mrf.mxu0 }
 0x11d   : > { %1251 = vst [vmem:[%s1685_s21 + $0x20] sm:$0xff] %v1191_v25   ;;  %v696_v29 = vadd.f32 %v695_v27, %v607_v26  ;;  %v658_v30 = vpop.f32.mrf.mxu1  ;;  %v570_v34 = vadd.f32 %v1678_v49, %v569_v28 }
 0x11f   : > { %v738_v32 = vmax.f32 %v696_v29, 0.0  ;;  %v659_v38 = vadd.f32 %v658_v30, %v570_v34 }
 0x121   : > { %v1231_v33 = vpack.c.bf16 %v738_v32, %v737_v31  ;;  %v723_v43 = vmax.f32 %v659_v38, 0.0 }
 0x122   : > { %v609_v35 = vpop.f32.mrf.mxu2 }
 0x123   : > { %1259 = vst [vmem:[%s1685_s21 + $0x60] sm:$0xff] %v1231_v33   ;;  %v698_v36 = vpop.f32.mrf.mxu3  ;;  %v610_v41 = vadd.f32 %v1678_v49, %v609_v35 }
 0x124   : > { %v571_v37 = vpop.f32.mrf.mxu0 }
 0x125   : > { %v572_v39 = vadd.f32 %v1678_v49, %v571_v37  ;;  %v660_v40 = vpop.f32.mrf.mxu1  ;;  %v699_v46 = vadd.f32 %v698_v36, %v610_v41 }
 0x127   : > { %v661_v42 = vadd.f32 %v660_v40, %v572_v39  ;;  %v739_v54 = vmax.f32 %v699_v46, 0.0 }
 0x129   : > { %v724_v44 = vmax.f32 %v661_v42, 0.0 }
 0x12a   : > { %v611_v45 = vpop.f32.mrf.mxu2 }
 0x12b   : > { %v1196_v47 = vpack.c.bf16 %v724_v44, %v723_v43  ;;  %v612_v48 = vadd.f32 %v1678_v49, %v611_v45  ;;  %v700_v50 = vpop.f32.mrf.mxu3 }
 0x12c   : > { %v574_v51 = vpop.f32.mrf.mxu0 }
 0x12d   : > { %1252 = vst [vmem:[%s1685_s21 + $0x28] sm:$0xff] %v1196_v47   ;;  %v701_v52 = vadd.f32 %v700_v50, %v612_v48  ;;  %v663_v53 = vpop.f32.mrf.mxu1  ;;  %v575_v57 = vadd.f32 %v1678_v49, %v574_v51 }
 0x12f   : > { %v740_v55 = vmax.f32 %v701_v52, 0.0  ;;  %v664_v61 = vadd.f32 %v663_v53, %v575_v57 }
 0x131   : > { %v1236_v56 = vpack.c.bf16 %v740_v55, %v739_v54  ;;  %v725_v2 = vmax.f32 %v664_v61, 0.0 }
 0x132   : > { %v614_v58 = vpop.f32.mrf.mxu2 }
 0x133   : > { %1260 = vst [vmem:[%s1685_s21 + $0x68] sm:$0xff] %v1236_v56   ;;  %v703_v59 = vpop.f32.mrf.mxu3  ;;  %v615_v0 = vadd.f32 %v1678_v49, %v614_v58 }
 0x134   : > { %v576_v60 = vpop.f32.mrf.mxu0 }
 0x135   : > { %v577_v62 = vadd.f32 %v1678_v49, %v576_v60  ;;  %v665_v63 = vpop.f32.mrf.mxu1  ;;  %v704_v5 = vadd.f32 %v703_v59, %v615_v0 }
 0x137   : > { %v666_v1 = vadd.f32 %v665_v63, %v577_v62  ;;  %v741_v12 = vmax.f32 %v704_v5, 0.0 }
 0x139   : > { %v726_v3 = vmax.f32 %v666_v1, 0.0 }
 0x13a   : > { %v616_v4 = vpop.f32.mrf.mxu2 }
 0x13b   : > { %v1201_v6 = vpack.c.bf16 %v726_v3, %v725_v2  ;;  %v617_v7 = vadd.f32 %v1678_v49, %v616_v4  ;;  %v705_v8 = vpop.f32.mrf.mxu3 }
 0x13c   : > { %v579_v9 = vpop.f32.mrf.mxu0 }
 0x13d   : > { %1253 = vst [vmem:[%s1685_s21 + $0x30] sm:$0xff] %v1201_v6   ;;  %v706_v10 = vadd.f32 %v705_v8, %v617_v7  ;;  %v668_v11 = vpop.f32.mrf.mxu1  ;;  %v580_v15 = vadd.f32 %v1678_v49, %v579_v9 }
 0x13f   : > { %v742_v13 = vmax.f32 %v706_v10, 0.0  ;;  %v669_v19 = vadd.f32 %v668_v11, %v580_v15 }
 0x141   : > { %v1241_v14 = vpack.c.bf16 %v742_v13, %v741_v12  ;;  %v727_v24 = vmax.f32 %v669_v19, 0.0 }
 0x142   : > { %v619_v16 = vpop.f32.mrf.mxu2 }
 0x143   : > { %1261 = vst [vmem:[%s1685_s21 + $0x70] sm:$0xff] %v1241_v14   ;;  %v708_v17 = vpop.f32.mrf.mxu3  ;;  %v620_v22 = vadd.f32 %v1678_v49, %v619_v16 }
 0x144   : > { %v581_v18 = vpop.f32.mrf.mxu0 }
 0x145   : > { %v582_v20 = vadd.f32 %v1678_v49, %v581_v18  ;;  %v670_v21 = vpop.f32.mrf.mxu1  ;;  %v709_v27 = vadd.f32 %v708_v17, %v620_v22 }
 0x147   : > { %v671_v23 = vadd.f32 %v670_v21, %v582_v20  ;;  %v743_v32 = vmax.f32 %v709_v27, 0.0 }
 0x149   : > { %v728_v25 = vmax.f32 %v671_v23, 0.0 }
 0x14a   : > { %v621_v26 = vpop.f32.mrf.mxu2 }
 0x14b   : > { %v1206_v28 = vpack.c.bf16 %v728_v25, %v727_v24  ;;  %v622_v29 = vadd.f32 %v1678_v49, %v621_v26  ;;  %v710_v30 = vpop.f32.mrf.mxu3 }
 0x14d   : > { %1254 = vst [vmem:[%s1685_s21 + $0x38] sm:$0xff] %v1206_v28   ;;  %v711_v31 = vadd.f32 %v710_v30, %v622_v29 }
 0x14f   : > { %v744_v33 = vmax.f32 %v711_v31, 0.0 }
 0x151   : > { %v1246_v34 = vpack.c.bf16 %v744_v33, %v743_v32 }
 0x153   : > { %1262 = vst [vmem:[%s1685_s21 + $0x78] sm:$0xff] %v1246_v34  }
 0x154   : > { %1430 = shalt.err (!%p1427_p10)
}
 0x155   : > { %s1480_s10 = smov 64   ;;  %s1481_s18 = smov 4  }
 0x156   : > { %1285 = dma.vmem_to_hbm [thread:$0]  (%p1569_p7), %s823_s29, 2048, %s825_s30, %s810_s16, %s1480_s10, %s1480_s10, %s1481_s18  }
 0x157 PF: > { %s839_s23 = sand.u32 1, %s1461_s12   ;;  %p1774_p12 = scmp.ge.s32.totalorder %s1473_s15, 2 }
 0x158   : > { %s840_s17 = scalar_lea.sflag [#allocation4], %s839_s23 }
 0x159   : > { %p1296_p13 = pnand %p1774_p12, %p1537_p6 }
 0x15b   : > { %p1297_p0 = pneg %p1296_p13 }
 0x15d   : > { %1456 = dma.done.wait (%p1297_p0), %s840_s17, 2048  }
 0x15e   : > { %1458 = vsyncadd (%p1297_p0), %s840_s17, 4294965248  ;;  %p17_p3 = scmp.ge.s32.totalorder %s1555_s26, 4   ;;  %s1775_s12 = smov %s1465_s13 }
 0x15f   : > { %s1776_s13 = smov %s1469_s14  ;;  %s1777_s14 = smov %s1565_s4 }
 0x160   : > { %s1778_s15 = smov %s1555_s26  ;;  %19 = sbr.rel (!%p17_p3) target bundleno = 6 (0x6), region = 81 }
 0x165   :  { %846 = vsyncpa [#allocation3], 1 }
 0x166   :  { %848 = vsyncpa [#allocation3 + $0x1], 1 }
 0x167   :  { %849 = vsyncpa [#allocation6], 1 }
 0x168   :  { %850 = vsyncpa [#allocation4], 1 }
 0x169   :  { %852 = vsyncpa [#allocation4 + $0x1], 1 }

</bundles_post_ra>
